<compile_context>
chip_gen: v6e
topology: v6e:2x2x1
jax: 0.10.0
libtpu: 0.0.40
codegen_flags: <defaults>
</compile_context>

<pallas_src>
import functools

import numpy as np
import jax
import jax.numpy as jnp
from jax import lax
from jax.experimental import pallas as pl
from jax.experimental.pallas import tpu as pltpu


# ---------------------------------------------------------------------------
# Hardware probing (generation-aware budgets)
# ---------------------------------------------------------------------------
@functools.lru_cache(maxsize=None)
def _hw():
    """Returns (vmem_bytes_per_core, device_kind_lowercase)."""
    kind = ""
    try:
        kind = jax.devices()[0].device_kind.lower()
    except Exception:
        pass
    vmem = None
    try:
        info = pltpu.get_tpu_info()
        for name in ("vmem_capacity_bytes", "vmem_bytes", "vmem_size_bytes"):
            v = getattr(info, name, None)
            if v:
                vmem = int(v)
                break
    except Exception:
        vmem = None
    if not vmem:
        if "v7" in kind:
            vmem = 64 << 20
        elif any(t in kind for t in ("v4", "v5", "v6")):
            vmem = 128 << 20
        elif any(t in kind for t in ("v2", "v3")):
            vmem = 16 << 20
        else:
            vmem = 64 << 20            # unknown chip: be conservative
    if "v7" in kind:
        vmem = min(vmem, 64 << 20)     # v7x VMEM is 64 MiB per TensorCore
    return int(vmem), kind


def _block_budget(vmem):
    # (input + output) bytes per grid step.  Bigger blocks amortize the ~0.35 us
    # per-step overhead: ~6 MiB on v7x (64 MiB VMEM), ~13 MiB on v5e/v6e (128 MiB).
    return int(min(16 << 20, max(2 << 20, vmem // 10)))


def _vmem_limit(vmem):
    # <= 48 MiB on v7x, ~96 MiB on v5e/v6e (their 128 MiB VMEM was being throttled).
    return int(min(96 << 20, max(8 << 20, (vmem * 3) // 4)))


def _mxu_hbm_crossover(kind, compute_dtype):
    """FLOP/byte above which the fused one-hot matmul turns MXU-bound."""
    if "v5" in kind:
        base = 240.0
    elif "v6" in kind:
        base = 680.0
    elif "v7" in kind:
        base = 310.0
    else:
        base = 500.0
    if jnp.dtype(compute_dtype).itemsize >= 4:
        base /= 3.0        # f32 matmuls decompose into multi-pass bf16 on the MXU
    return base


_NATIVE_DTYPES = (jnp.dtype(jnp.float32), jnp.dtype(jnp.bfloat16))


def _compute_dtype(dtype):
    dtype = jnp.dtype(dtype)
    # TODO(synk): integer inputs ride the f32 one-hot matmul — exact only up to 2**24.
    return dtype if dtype in _NATIVE_DTYPES else jnp.dtype(jnp.float32)


# ---------------------------------------------------------------------------
# Index / selection-matrix helpers (PyTorch 'nearest' rule)
# ---------------------------------------------------------------------------
def _nearest_indices(in_size: int, out_size: int) -> np.ndarray:
    return (np.arange(out_size) * in_size) // out_size


def _fused_selection_matrix(H_in, W_in, H_out, W_out, dtype):
    """One-hot S of shape (H_in*W_in, H_out*W_out): out_flat = x_flat @ S."""
    rows = _nearest_indices(H_in, H_out)
    cols = _nearest_indices(W_in, W_out)
    src = (rows[:, None] * W_in + cols[None, :]).reshape(-1)        # (H_out*W_out,)
    S = np.zeros((H_in * W_in, H_out * W_out), dtype=np.float32)
    S[src, np.arange(H_out * W_out)] = 1.0
    return jnp.asarray(S, dtype=dtype)


def _onehot(in_size, out_size, dtype):
    """One-hot selector (out_size, in_size) for the separable path."""
    idx = _nearest_indices(in_size, out_size)
    m = np.zeros((out_size, in_size), dtype=np.float32)
    m[np.arange(out_size), idx] = 1.0
    return jnp.asarray(m, dtype=dtype)


# ---------------------------------------------------------------------------
# Kernels
# ---------------------------------------------------------------------------
def _fused_kernel(x_ref, s_ref, o_ref):
    # x_ref: (B, H_in*W_in), s_ref: (H_in*W_in, H_out*W_out), o_ref: (B, H_out*W_out)
    o_ref[...] = jnp.dot(
        x_ref[...], s_ref[...], preferred_element_type=jnp.float32
    ).astype(o_ref.dtype)


def _separable_kernel(x_ref, r_ref, c_ref, o_ref, *, cols_first: bool):
    # x_ref: (B, H_in, W_in); r_ref: (H_out, H_in); c_ref: (W_in, W_out);
    # o_ref: (B, H_out, W_out).  Per plane: out = R @ x @ C.  One-hot selectors +
    # f32 accumulation make this a bit-exact gather; only plain 2-D MXU dots are used.
    # TODO(synk): the H-axis one-hot dot could become sublane row copies (jnp.take),
    # halving MXU work, once that lowering is validated on all target chips.
    nb = x_ref.shape[0]
    r = r_ref[...]
    c = c_ref[...]

    def body(b, carry):
        xb = x_ref[b]                                                   # (H_in, W_in)
        if cols_first:
            t = jnp.dot(xb, c, preferred_element_type=jnp.float32).astype(xb.dtype)
            y = jnp.dot(r, t, preferred_element_type=jnp.float32)       # (H_out, W_out)
        else:
            t = jnp.dot(r, xb, preferred_element_type=jnp.float32).astype(xb.dtype)
            y = jnp.dot(t, c, preferred_element_type=jnp.float32)       # (H_out, W_out)
        o_ref[b] = y.astype(o_ref.dtype)
        return carry

    lax.fori_loop(0, nb, body, 0, unroll=(nb <= 8))


# ---------------------------------------------------------------------------
# Tiling decisions
# ---------------------------------------------------------------------------
def _choose_batch(nc, bytes_per_plane, align, budget, split_for_cores):
    """Planes per grid step: biggest block within the generation-aware budget."""
    b = int(max(1, budget // max(1, bytes_per_plane)))
    if split_for_cores and nc >= 2:
        b = min(b, -(-nc // 2))      # aim for >=2 grid steps so both v7x TCs get work
    if b >= nc:
        return int(nc)
    if align > 1:
        # keep the block's second-minor dim sublane-packed (8 f32 / 16 bf16)
        b = max(align, (b // align) * align)
    return int(min(b, nc))


def _pick_path(H_in, W_in, H_out, W_out, dtype):
    vmem, kind = _hw()
    cdt = _compute_dtype(dtype)
    itemsize = cdt.itemsize
    k_in, n_out = H_in * W_in, H_out * W_out
    s_cap = int(min(8 << 20, max(1 << 20, vmem // 16)))
    if k_in * n_out * itemsize > s_cap:
        return "separable"                       # selection matrix too big for VMEM
    # FLOP-aware crossover: keep the kernel on the HBM roofline (esp. v5e f32).
    intensity = (2.0 * k_in * n_out) / ((k_in + n_out) * itemsize)
    if intensity > _mxu_hbm_crossover(kind, cdt):
        return "separable"
    return "fused"


# ---------------------------------------------------------------------------
# Per-configuration builder (cached: constants baked once, no per-call upload)
# ---------------------------------------------------------------------------
@functools.lru_cache(maxsize=None)
def _build_upsample(N, C, H_in, W_in, H_out, W_out, dtype, path):
    out_dtype = jnp.dtype(dtype)
    cdt = _compute_dtype(dtype)
    itemsize = cdt.itemsize
    NC = N * C
    k_in, n_out = H_in * W_in, H_out * W_out
    vmem, kind = _hw()
    budget = _block_budget(vmem)
    vmem_limit = _vmem_limit(vmem)
    split = "v7" in kind                          # 2 TensorCores per chip
    sublane = 16 if cdt == jnp.dtype(jnp.bfloat16) else 8
    io_bytes = NC * (k_in + n_out) * itemsize

    if path == "fused":
        S = _fused_selection_matrix(H_in, W_in, H_out, W_out, cdt)
        B = _choose_batch(NC, (k_in + n_out) * itemsize, sublane, budget, split)
        grid = (pl.cdiv(NC, B),)
        # Constant index_map => Pallas does not re-DMA S per grid step.
        # TODO(synk): pipeline_mode=pl.Buffered(1) on the S spec would drop its second
        # (double-buffer) VMEM copy; budgets already leave ample headroom, so omitted.
        call = pl.pallas_call(
            _fused_kernel,
            out_shape=jax.ShapeDtypeStruct((NC, n_out), out_dtype),
            grid_spec=pltpu.PrefetchScalarGridSpec(
                num_scalar_prefetch=0,
                grid=grid,
                in_specs=[
                    pl.BlockSpec((B, k_in), lambda i: (i, 0)),
                    pl.BlockSpec((k_in, n_out), lambda i: (0, 0)),   # resident selector
                ],
                out_specs=pl.BlockSpec((B, n_out), lambda i: (i, 0)),
            ),
            compiler_params=pltpu.CompilerParams(
                dimension_semantics=("parallel",),
                vmem_limit_bytes=vmem_limit,
            ),
            cost_estimate=pl.CostEstimate(
                flops=2 * NC * k_in * n_out,
                transcendentals=0,
                bytes_accessed=io_bytes + k_in * n_out * itemsize,
            ),
        )

        def fn(x):
            x2d = x.reshape(NC, k_in)
            if x2d.dtype != cdt:
                x2d = x2d.astype(cdt)
            return call(x2d, S).reshape(N, C, H_out, W_out)

        return jax.jit(fn)

    # ---- separable path: per-plane R @ x @ C with one-hot selectors ----------
    R = _onehot(H_in, H_out, cdt)            # (H_out, H_in)
    Cm = _onehot(W_in, W_out, cdt).T         # (W_in, W_out)
    cols_first = H_in * W_out * (W_in + H_out) <= H_out * W_in * (H_in + W_out)
    B = _choose_batch(NC, (k_in + n_out) * itemsize, 1, budget, split)
    grid = (pl.cdiv(NC, B),)
    flops = (2 * NC * H_in * W_out * (W_in + H_out) if cols_first
             else 2 * NC * H_out * W_in * (H_in + W_out))
    # TODO(synk): when W_out < 128 the (B, H_out, W_out) output block stores are
    # lane-masked; a lane-dense (B, H_out*W_out) layout needs an in-kernel relayout
    # that is not worth the risk for this fallback path.
    call = pl.pallas_call(
        functools.partial(_separable_kernel, cols_first=cols_first),
        out_shape=jax.ShapeDtypeStruct((NC, H_out, W_out), out_dtype),
        grid_spec=pltpu.PrefetchScalarGridSpec(
            num_scalar_prefetch=0,
            grid=grid,
            in_specs=[
                pl.BlockSpec((B, H_in, W_in), lambda i: (i, 0, 0)),
                pl.BlockSpec((H_out, H_in), lambda i: (0, 0)),       # resident
                pl.BlockSpec((W_in, W_out), lambda i: (0, 0)),       # resident
            ],
            out_specs=pl.BlockSpec((B, H_out, W_out), lambda i: (i, 0, 0)),
        ),
        compiler_params=pltpu.CompilerParams(
            dimension_semantics=("parallel",),
            vmem_limit_bytes=vmem_limit,
        ),
        cost_estimate=pl.CostEstimate(
            flops=flops,
            transcendentals=0,
            bytes_accessed=io_bytes + (R.size + Cm.size) * itemsize,
        ),
    )

    def fn(x):
        x3d = x.reshape(NC, H_in, W_in)
        if x3d.dtype != cdt:
            x3d = x3d.astype(cdt)
        return call(x3d, R, Cm).reshape(N, C, H_out, W_out)

    return jax.jit(fn)


# ---------------------------------------------------------------------------
# Public wrapper (forward pass of the PyTorch UpSample module)
# ---------------------------------------------------------------------------
def upsample_nearest(x: jax.Array, img_shape, *, _force_path=None) -> jax.Array:
    """x: (N, C, H_in, W_in) -> (N, C, H_out, W_out), PyTorch F.interpolate 'nearest'."""
    if isinstance(img_shape, int):
        img_shape = (img_shape, img_shape)
    N, C, H_in, W_in = x.shape
    H_out, W_out = int(img_shape[0]), int(img_shape[1])
    if H_in == H_out and W_in == W_out:
        return x
    path = _force_path or _pick_path(H_in, W_in, H_out, W_out, x.dtype)
    fn = _build_upsample(int(N), int(C), int(H_in), int(W_in), H_out, W_out,
                         jnp.dtype(x.dtype), path)
    return fn(x)


# ---------------------------------------------------------------------------
# Reference & demo
# ---------------------------------------------------------------------------
def _reference_nearest(x_np: np.ndarray, img_shape) -> np.ndarray:
    """Pure-numpy reference with the PyTorch 'nearest' index rule."""
    H_out, W_out = img_shape
    _, _, H_in, W_in = x_np.shape
    rows = (np.arange(H_out) * H_in) // H_out
    cols = (np.arange(W_out) * W_in) // W_out
    return x_np[:, :, rows][:, :, :, cols]


if __name__ == "__main__":
    key = jax.random.PRNGKey(0)
    N, C, H_in, W_in = 2, 4, 16, 16
    img_shape = (32, 32)

    x = jax.random.normal(key, (N, C, H_in, W_in), dtype=jnp.float32)
    ref = _reference_nearest(np.asarray(x), img_shape)

    # Auto path (generation-aware fused/separable choice).
    out = jax.block_until_ready(upsample_nearest(x, img_shape))
    np.testing.assert_allclose(np.asarray(out), ref, rtol=0, atol=0)
    assert out.shape == (N, C, img_shape[0], img_shape[1])
    assert out.dtype == x.dtype

    # Validate both kernels explicitly so every code path is proven on this device.
    for path in ("fused", "separable"):
        o = jax.block_until_ready(upsample_nearest(x, img_shape, _force_path=path))
        np.testing.assert_allclose(np.asarray(o), ref, rtol=0, atol=0)

    print("KERNEL_OK")
</pallas_src>

<mosaic_0001>
module attributes {stable_mosaic.version = 11 : i64} {
  func.func @_fused_kernel(%arg0: i32, %arg1: memref<8x256xf32, #tpu.memory_space<vmem>>, %arg2: memref<256x1024xf32, #tpu.memory_space<vmem>>, %arg3: memref<8x1024xf32, #tpu.memory_space<vmem>>) attributes {dimension_semantics = [#tpu.dimension_semantics<parallel>], iteration_bounds = array<i64: 1>, scalar_prefetch = 0 : i64, scratch_operands = 0 : i64, tpu.core_type = #tpu.core_type<tc>, window_params = [{transform_indices = @transform_0, window_bounds = array<i64: 8, 256>}, {pipeline_mode = #tpu.pipeline_mode<synchronous>, transform_indices = @transform_1, window_bounds = array<i64: 256, 1024>}, {transform_indices = @transform_2, window_bounds = array<i64: 8, 1024>}]} {
    %c0 = arith.constant 0 : index
    %c0_0 = arith.constant 0 : index
    %0 = vector.load %arg1[%c0, %c0_0] : memref<8x256xf32, #tpu.memory_space<vmem>>, vector<8x256xf32>
    %c0_1 = arith.constant 0 : index
    %c0_2 = arith.constant 0 : index
    %1 = vector.load %arg2[%c0_1, %c0_2] : memref<256x1024xf32, #tpu.memory_space<vmem>>, vector<256x1024xf32>
    %cst = arith.constant dense<0.000000e+00> : vector<8x1024xf32>
    %2 = tpu.matmul %0, %1, %cst {dimension_numbers = #tpu.dot_dimension_numbers<[1], [0], [0], [1], [0, 0, 1, 1], [], []>} : vector<8x256xf32>, vector<256x1024xf32>, vector<8x1024xf32> -> vector<8x1024xf32>
    %c0_3 = arith.constant 0 : index
    %c0_4 = arith.constant 0 : index
    %3 = vector.load %arg3[%c0_3, %c0_4] : memref<8x1024xf32, #tpu.memory_space<vmem>>, vector<8x1024xf32>
    tpu.vector_store %arg3[%c0_3, %c0_4], %2 {strides = array<i32>} : memref<8x1024xf32, #tpu.memory_space<vmem>>, vector<8x1024xf32>,
    return
  }
  func.func @transform_0(%arg0: i32) -> (i32, i32) {
    %c0_i32 = arith.constant 0 : i32
    %c0_i32_0 = arith.constant 0 : i32
    return %arg0, %c0_i32 : i32, i32
  }
  func.func @transform_1(%arg0: i32) -> (i32, i32) {
    %c0_i32 = arith.constant 0 : i32
    %c0_i32_0 = arith.constant 0 : i32
    %c0_i32_1 = arith.constant 0 : i32
    return %c0_i32, %c0_i32_0 : i32, i32
  }
  func.func @transform_2(%arg0: i32) -> (i32, i32) {
    %c0_i32 = arith.constant 0 : i32
    %c0_i32_0 = arith.constant 0 : i32
    return %arg0, %c0_i32 : i32, i32
  }
}

</mosaic_0001>

<bundles_post_ra>
// kernel: fn.1
= control target key start
LH: loop header
LB: loop body
LE: loop exit
PB: predicated region body
PF: predicated region fallthrough
CT: control target
= control target key end

     0   :  { %7 = vsyncpa [#allocation3], 0  ;;  %s605_s9 = smov [#allocation2]   ;;  %s668_s0 = inlined_call_operand.vmem [shape: f32[8,256], index: 0, kind: input, shape index: {}]   ;;  %s669_s1 = inlined_call_operand.hbm [shape: f32[256,1024], index: 1, kind: input, shape index: {}]   ;;  %s670_s2 = inlined_call_operand.vmem [shape: f32[8,1024], index: 2, kind: output, shape index: {}]  }
   0x1   :  { %s15_s10 = sshll.u32 %s605_s9, 4  ;;  %s16_s10 = int_to_ptr.vmem [resolvable:$true] %s15_s10 }
   0x2   :  { %s591_s11 = scalar_lea.vmem %s16_s10, 32768  ;;  %p596_p1 = scmp.lt.s32.totalorder %s16_s10, %s16_s10 }
   0x3   :  { %p592_p0 = scmp.ne.s32.totalorder %s16_s10, %s591_s11  ;;  %p597_p2 = scmp.lt.s32.totalorder %s591_s11, %s591_s11 }
   0x5   :  { %p598_p3 = por %p597_p2, %p596_p1 }
   0x7   :  { %p599_p4 = pnand %p598_p3, %p592_p0 }
   0x9   :  { %602 = shalt.err (!%p599_p4)
}
   0xa   :  { %s606_s12 = smov 1024   ;;  %s607_s13 = smov 64  }
   0xb   :  { %21 = dma.hbm_to_vmem [thread:$0]  %s669_s1, 32768, %s16_s10, [#allocation3], %s606_s12, %s606_s12, %s607_s13  }
   0xc   :  { %603 = dma.done.wait [#allocation3], 32768  }
   0xd   :  { %604 = vsyncadd [#allocation3], 4294934528  ;;  %v148_v0 = vld [vmem:[#allocation2 + $0x3c8] sm:$0xff]  ;;  %v150_v1 = vld [vmem:[#allocation2 + $0x3d8] sm:$0xff] }
   0xe   :  { %v147_v2 = vld [vmem:[#allocation2 + $0x3c0] sm:$0xff]  ;;  %283 = vmatprep.subr.mxu0 %v148_v0  ;;  %354 = vmatprep.subr.mxu1 %v150_v1  ;;  %v149_v3 = vld [vmem:[#allocation2 + $0x3d0] sm:$0xff]  ;;  %v140_v4 = vld [vmem:[#allocation2 + $0x388] sm:$0xff] }
   0xf   :  { %v142_v5 = vld [vmem:[#allocation2 + $0x398] sm:$0xff]  ;;  %284 = vmatpush1.msra.mxu0 %v147_v2  ;;  %355 = vmatpush1.msra.mxu1 %v149_v3  ;;  %v139_v6 = vld [vmem:[#allocation2 + $0x380] sm:$0xff]  ;;  %v141_v7 = vld [vmem:[#allocation2 + $0x390] sm:$0xff] }
  0x10   :  { %v132_v8 = vld [vmem:[#allocation2 + $0x348] sm:$0xff]  ;;  %285 = vmatprep.subr.mxu0 %v140_v4  ;;  %356 = vmatprep.subr.mxu1 %v142_v5  ;;  %v134_v9 = vld [vmem:[#allocation2 + $0x358] sm:$0xff]  ;;  %v131_v10 = vld [vmem:[#allocation2 + $0x340] sm:$0xff] }
  0x11   :  { %v133_v11 = vld [vmem:[#allocation2 + $0x350] sm:$0xff]  ;;  %286 = vmatpush1.msra.mxu0 %v139_v6  ;;  %357 = vmatpush1.msra.mxu1 %v141_v7  ;;  %v124_v12 = vld [vmem:[#allocation2 + $0x308] sm:$0xff]  ;;  %v126_v13 = vld [vmem:[#allocation2 + $0x318] sm:$0xff] }
  0x12   :  { %287 = vmatprep.subr.mxu0 %v132_v8  ;;  %358 = vmatprep.subr.mxu1 %v134_v9  ;;  %v123_v14 = vld [vmem:[#allocation2 + $0x300] sm:$0xff]  ;;  %v125_v15 = vld [vmem:[#allocation2 + $0x310] sm:$0xff]  ;;  %v116_v16 = vld [vmem:[#allocation2 + $0x2c8] sm:$0xff] }
  0x13   :  { %288 = vmatpush1.msra.mxu0 %v131_v10  ;;  %359 = vmatpush1.msra.mxu1 %v133_v11  ;;  %v118_v17 = vld [vmem:[#allocation2 + $0x2d8] sm:$0xff]  ;;  %v115_v18 = vld [vmem:[#allocation2 + $0x2c0] sm:$0xff]  ;;  %v117_v19 = vld [vmem:[#allocation2 + $0x2d0] sm:$0xff] }
  0x14   :  { %289 = vmatprep.subr.mxu0 %v124_v12  ;;  %360 = vmatprep.subr.mxu1 %v126_v13  ;;  %v108_v20 = vld [vmem:[#allocation2 + $0x288] sm:$0xff]  ;;  %v110_v21 = vld [vmem:[#allocation2 + $0x298] sm:$0xff]  ;;  %v107_v22 = vld [vmem:[#allocation2 + $0x280] sm:$0xff] }
  0x15   :  { %290 = vmatpush1.msra.mxu0 %v123_v14  ;;  %361 = vmatpush1.msra.mxu1 %v125_v15  ;;  %v109_v23 = vld [vmem:[#allocation2 + $0x290] sm:$0xff]  ;;  %v100_v24 = vld [vmem:[#allocation2 + $0x248] sm:$0xff]  ;;  %v102_v25 = vld [vmem:[#allocation2 + $0x258] sm:$0xff] }
  0x16   :  { %291 = vmatprep.subr.mxu0 %v116_v16  ;;  %362 = vmatprep.subr.mxu1 %v118_v17  ;;  %v99_v26 = vld [vmem:[#allocation2 + $0x240] sm:$0xff]  ;;  %v101_v27 = vld [vmem:[#allocation2 + $0x250] sm:$0xff]  ;;  %v92_v28 = vld [vmem:[#allocation2 + $0x208] sm:$0xff] }
  0x17   :  { %292 = vmatpush1.msra.mxu0 %v115_v18  ;;  %363 = vmatpush1.msra.mxu1 %v117_v19  ;;  %v94_v29 = vld [vmem:[#allocation2 + $0x218] sm:$0xff]  ;;  %v91_v30 = vld [vmem:[#allocation2 + $0x200] sm:$0xff]  ;;  %v93_v31 = vld [vmem:[#allocation2 + $0x210] sm:$0xff] }
  0x18   :  { %293 = vmatprep.subr.mxu0 %v108_v20  ;;  %364 = vmatprep.subr.mxu1 %v110_v21  ;;  %v84_v32 = vld [vmem:[#allocation2 + $0x1c8] sm:$0xff]  ;;  %v86_v33 = vld [vmem:[#allocation2 + $0x1d8] sm:$0xff]  ;;  %v83_v34 = vld [vmem:[#allocation2 + $0x1c0] sm:$0xff] }
  0x19   :  { %294 = vmatpush1.msra.mxu0 %v107_v22  ;;  %365 = vmatpush1.msra.mxu1 %v109_v23  ;;  %v85_v35 = vld [vmem:[#allocation2 + $0x1d0] sm:$0xff]  ;;  %v76_v36 = vld [vmem:[#allocation2 + $0x188] sm:$0xff]  ;;  %v78_v37 = vld [vmem:[#allocation2 + $0x198] sm:$0xff] }
  0x1a   :  { %295 = vmatprep.subr.mxu0 %v100_v24  ;;  %366 = vmatprep.subr.mxu1 %v102_v25  ;;  %v75_v38 = vld [vmem:[#allocation2 + $0x180] sm:$0xff]  ;;  %v77_v39 = vld [vmem:[#allocation2 + $0x190] sm:$0xff]  ;;  %v68_v40 = vld [vmem:[#allocation2 + $0x148] sm:$0xff] }
  0x1b   :  { %296 = vmatpush1.msra.mxu0 %v99_v26  ;;  %367 = vmatpush1.msra.mxu1 %v101_v27  ;;  %v70_v41 = vld [vmem:[#allocation2 + $0x158] sm:$0xff]  ;;  %v67_v42 = vld [vmem:[#allocation2 + $0x140] sm:$0xff]  ;;  %v69_v43 = vld [vmem:[#allocation2 + $0x150] sm:$0xff] }
  0x1c   :  { %297 = vmatprep.subr.mxu0 %v92_v28  ;;  %368 = vmatprep.subr.mxu1 %v94_v29  ;;  %v60_v44 = vld [vmem:[#allocation2 + $0x108] sm:$0xff]  ;;  %v62_v45 = vld [vmem:[#allocation2 + $0x118] sm:$0xff]  ;;  %v59_v46 = vld [vmem:[#allocation2 + $0x100] sm:$0xff] }
  0x1d   :  { %298 = vmatpush1.msra.mxu0 %v91_v30  ;;  %369 = vmatpush1.msra.mxu1 %v93_v31  ;;  %v61_v47 = vld [vmem:[#allocation2 + $0x110] sm:$0xff]  ;;  %v52_v48 = vld [vmem:[#allocation2 + $0xc8] sm:$0xff]  ;;  %v54_v49 = vld [vmem:[#allocation2 + $0xd8] sm:$0xff] }
  0x1e   :  { %299 = vmatprep.subr.mxu0 %v84_v32  ;;  %370 = vmatprep.subr.mxu1 %v86_v33  ;;  %v51_v50 = vld [vmem:[#allocation2 + $0xc0] sm:$0xff]  ;;  %v53_v51 = vld [vmem:[#allocation2 + $0xd0] sm:$0xff]  ;;  %v44_v52 = vld [vmem:[#allocation2 + $0x88] sm:$0xff] }
  0x1f   :  { %300 = vmatpush1.msra.mxu0 %v83_v34  ;;  %371 = vmatpush1.msra.mxu1 %v85_v35  ;;  %v46_v53 = vld [vmem:[#allocation2 + $0x98] sm:$0xff]  ;;  %v43_v54 = vld [vmem:[#allocation2 + $0x80] sm:$0xff]  ;;  %v45_v55 = vld [vmem:[#allocation2 + $0x90] sm:$0xff] }
  0x20   :  { %301 = vmatprep.subr.mxu0 %v76_v36  ;;  %372 = vmatprep.subr.mxu1 %v78_v37  ;;  %v36_v56 = vld [vmem:[#allocation2 + $0x48] sm:$0xff]  ;;  %v38_v57 = vld [vmem:[#allocation2 + $0x58] sm:$0xff]  ;;  %v35_v58 = vld [vmem:[#allocation2 + $0x40] sm:$0xff] }
  0x21   :  { %302 = vmatpush1.msra.mxu0 %v75_v38  ;;  %373 = vmatpush1.msra.mxu1 %v77_v39  ;;  %v37_v59 = vld [vmem:[#allocation2 + $0x50] sm:$0xff]  ;;  %v28_v60 = vld [vmem:[#allocation2 + $0x8] sm:$0xff]  ;;  %v30_v61 = vld [vmem:[#allocation2 + $0x18] sm:$0xff] }
  0x22   :  { %303 = vmatprep.subr.mxu0 %v68_v40  ;;  %374 = vmatprep.subr.mxu1 %v70_v41  ;;  %v27_v62 = vld [vmem:[#allocation2] sm:$0xff]  ;;  %v29_v63 = vld [vmem:[#allocation2 + $0x10] sm:$0xff]  ;;  %v276_v0 = vld [vmem:[#allocation2 + $0x7c8] sm:$0xff] }
  0x23   :  { %304 = vmatpush1.msra.mxu0 %v67_v42  ;;  %375 = vmatpush1.msra.mxu1 %v69_v43  ;;  %v278_v1 = vld [vmem:[#allocation2 + $0x7d8] sm:$0xff]  ;;  %v275_v2 = vld [vmem:[#allocation2 + $0x7c0] sm:$0xff]  ;;  %v277_v3 = vld [vmem:[#allocation2 + $0x7d0] sm:$0xff] }
  0x24   :  { %305 = vmatprep.subr.mxu0 %v60_v44  ;;  %376 = vmatprep.subr.mxu1 %v62_v45  ;;  %v268_v4 = vld [vmem:[#allocation2 + $0x788] sm:$0xff]  ;;  %v270_v5 = vld [vmem:[#allocation2 + $0x798] sm:$0xff]  ;;  %v267_v6 = vld [vmem:[#allocation2 + $0x780] sm:$0xff] }
  0x25   :  { %306 = vmatpush1.msra.mxu0 %v59_v46  ;;  %377 = vmatpush1.msra.mxu1 %v61_v47  ;;  %v269_v7 = vld [vmem:[#allocation2 + $0x790] sm:$0xff]  ;;  %v260_v8 = vld [vmem:[#allocation2 + $0x748] sm:$0xff]  ;;  %v262_v9 = vld [vmem:[#allocation2 + $0x758] sm:$0xff] }
  0x26   :  { %307 = vmatprep.subr.mxu0 %v52_v48  ;;  %378 = vmatprep.subr.mxu1 %v54_v49  ;;  %v259_v10 = vld [vmem:[#allocation2 + $0x740] sm:$0xff]  ;;  %v261_v11 = vld [vmem:[#allocation2 + $0x750] sm:$0xff]  ;;  %v252_v12 = vld [vmem:[#allocation2 + $0x708] sm:$0xff] }
  0x27   :  { %308 = vmatpush1.msra.mxu0 %v51_v50  ;;  %379 = vmatpush1.msra.mxu1 %v53_v51  ;;  %v254_v13 = vld [vmem:[#allocation2 + $0x718] sm:$0xff]  ;;  %v251_v14 = vld [vmem:[#allocation2 + $0x700] sm:$0xff]  ;;  %v253_v15 = vld [vmem:[#allocation2 + $0x710] sm:$0xff] }
  0x28   :  { %309 = vmatprep.subr.mxu0 %v44_v52  ;;  %380 = vmatprep.subr.mxu1 %v46_v53  ;;  %v244_v16 = vld [vmem:[#allocation2 + $0x6c8] sm:$0xff]  ;;  %v246_v17 = vld [vmem:[#allocation2 + $0x6d8] sm:$0xff]  ;;  %v243_v18 = vld [vmem:[#allocation2 + $0x6c0] sm:$0xff] }
  0x29   :  { %310 = vmatpush1.msra.mxu0 %v43_v54  ;;  %381 = vmatpush1.msra.mxu1 %v45_v55  ;;  %v245_v19 = vld [vmem:[#allocation2 + $0x6d0] sm:$0xff]  ;;  %v236_v20 = vld [vmem:[#allocation2 + $0x688] sm:$0xff]  ;;  %v238_v21 = vld [vmem:[#allocation2 + $0x698] sm:$0xff] }
  0x2a   :  { %311 = vmatprep.subr.mxu0 %v36_v56  ;;  %382 = vmatprep.subr.mxu1 %v38_v57  ;;  %v235_v22 = vld [vmem:[#allocation2 + $0x680] sm:$0xff]  ;;  %v237_v23 = vld [vmem:[#allocation2 + $0x690] sm:$0xff]  ;;  %v228_v24 = vld [vmem:[#allocation2 + $0x648] sm:$0xff] }
  0x2b   :  { %312 = vmatpush1.msra.mxu0 %v35_v58  ;;  %383 = vmatpush1.msra.mxu1 %v37_v59  ;;  %v230_v25 = vld [vmem:[#allocation2 + $0x658] sm:$0xff]  ;;  %v227_v26 = vld [vmem:[#allocation2 + $0x640] sm:$0xff]  ;;  %v229_v27 = vld [vmem:[#allocation2 + $0x650] sm:$0xff] }
  0x2c   :  { %313 = vmatprep.subr.mxu0 %v28_v60  ;;  %384 = vmatprep.subr.mxu1 %v30_v61  ;;  %v220_v28 = vld [vmem:[#allocation2 + $0x608] sm:$0xff]  ;;  %v222_v29 = vld [vmem:[#allocation2 + $0x618] sm:$0xff]  ;;  %v219_v30 = vld [vmem:[#allocation2 + $0x600] sm:$0xff] }
  0x2d   :  { %314 = vmatpush1.msra.mxu0 %v27_v62  ;;  %385 = vmatpush1.msra.mxu1 %v29_v63  ;;  %v221_v31 = vld [vmem:[#allocation2 + $0x610] sm:$0xff]  ;;  %v212_v32 = vld [vmem:[#allocation2 + $0x5c8] sm:$0xff]  ;;  %v214_v33 = vld [vmem:[#allocation2 + $0x5d8] sm:$0xff] }
  0x2e   :  { %315 = vmatprep.subr.mxu0 %v276_v0  ;;  %386 = vmatprep.subr.mxu1 %v278_v1  ;;  %v211_v34 = vld [vmem:[#allocation2 + $0x5c0] sm:$0xff]  ;;  %v213_v35 = vld [vmem:[#allocation2 + $0x5d0] sm:$0xff]  ;;  %v204_v36 = vld [vmem:[#allocation2 + $0x588] sm:$0xff] }
  0x2f   :  { %316 = vmatpush2.msra.mxu0 %v275_v2  ;;  %387 = vmatpush2.msra.mxu1 %v277_v3  ;;  %v206_v37 = vld [vmem:[#allocation2 + $0x598] sm:$0xff]  ;;  %v203_v38 = vld [vmem:[#allocation2 + $0x580] sm:$0xff]  ;;  %v205_v39 = vld [vmem:[#allocation2 + $0x590] sm:$0xff] }
  0x30   :  { %317 = vmatprep.subr.mxu0 %v268_v4  ;;  %388 = vmatprep.subr.mxu1 %v270_v5  ;;  %v196_v40 = vld [vmem:[#allocation2 + $0x548] sm:$0xff]  ;;  %v198_v41 = vld [vmem:[#allocation2 + $0x558] sm:$0xff]  ;;  %v195_v42 = vld [vmem:[#allocation2 + $0x540] sm:$0xff] }
  0x31   :  { %318 = vmatpush2.msra.mxu0 %v267_v6  ;;  %389 = vmatpush2.msra.mxu1 %v269_v7  ;;  %v197_v43 = vld [vmem:[#allocation2 + $0x550] sm:$0xff]  ;;  %v188_v44 = vld [vmem:[#allocation2 + $0x508] sm:$0xff]  ;;  %v190_v45 = vld [vmem:[#allocation2 + $0x518] sm:$0xff] }
  0x32   :  { %319 = vmatprep.subr.mxu0 %v260_v8  ;;  %390 = vmatprep.subr.mxu1 %v262_v9  ;;  %v187_v46 = vld [vmem:[#allocation2 + $0x500] sm:$0xff]  ;;  %v189_v47 = vld [vmem:[#allocation2 + $0x510] sm:$0xff]  ;;  %v180_v48 = vld [vmem:[#allocation2 + $0x4c8] sm:$0xff] }
  0x33   :  { %320 = vmatpush2.msra.mxu0 %v259_v10  ;;  %391 = vmatpush2.msra.mxu1 %v261_v11  ;;  %v182_v49 = vld [vmem:[#allocation2 + $0x4d8] sm:$0xff]  ;;  %v179_v50 = vld [vmem:[#allocation2 + $0x4c0] sm:$0xff]  ;;  %v181_v51 = vld [vmem:[#allocation2 + $0x4d0] sm:$0xff] }
  0x34   :  { %321 = vmatprep.subr.mxu0 %v252_v12  ;;  %392 = vmatprep.subr.mxu1 %v254_v13  ;;  %v172_v52 = vld [vmem:[#allocation2 + $0x488] sm:$0xff]  ;;  %v174_v53 = vld [vmem:[#allocation2 + $0x498] sm:$0xff]  ;;  %v171_v54 = vld [vmem:[#allocation2 + $0x480] sm:$0xff] }
  0x35   :  { %322 = vmatpush2.msra.mxu0 %v251_v14  ;;  %393 = vmatpush2.msra.mxu1 %v253_v15  ;;  %v173_v55 = vld [vmem:[#allocation2 + $0x490] sm:$0xff]  ;;  %v164_v56 = vld [vmem:[#allocation2 + $0x448] sm:$0xff]  ;;  %v166_v57 = vld [vmem:[#allocation2 + $0x458] sm:$0xff] }
  0x36   :  { %323 = vmatprep.subr.mxu0 %v244_v16  ;;  %394 = vmatprep.subr.mxu1 %v246_v17  ;;  %v163_v58 = vld [vmem:[#allocation2 + $0x440] sm:$0xff]  ;;  %v165_v59 = vld [vmem:[#allocation2 + $0x450] sm:$0xff]  ;;  %v156_v60 = vld [vmem:[#allocation2 + $0x408] sm:$0xff] }
  0x37   :  { %324 = vmatpush2.msra.mxu0 %v243_v18  ;;  %395 = vmatpush2.msra.mxu1 %v245_v19  ;;  %v158_v61 = vld [vmem:[#allocation2 + $0x418] sm:$0xff]  ;;  %v155_v62 = vld [vmem:[#allocation2 + $0x400] sm:$0xff]  ;;  %v629_v63 = vld [vmem:[%s668_s0 + $0x8] sm:$0xff] }
  0x38   :  { %325 = vmatprep.subr.mxu0 %v236_v20  ;;  %396 = vmatprep.subr.mxu1 %v238_v21  ;;  %v157_v0 = vld [vmem:[#allocation2 + $0x410] sm:$0xff]  ;;  %v634_v1 = vld [vmem:[%s668_s0] sm:$0xff]  ;;  %v152_v2 = vld [vmem:[#allocation2 + $0x3e8] sm:$0xff] }
  0x39   :  { %326 = vmatpush2.msra.mxu0 %v235_v22  ;;  %397 = vmatpush2.msra.mxu1 %v237_v23  ;;  %v154_v3 = vld [vmem:[#allocation2 + $0x3f8] sm:$0xff]  ;;  %v151_v4 = vld [vmem:[#allocation2 + $0x3e0] sm:$0xff]  ;;  %v153_v5 = vld [vmem:[#allocation2 + $0x3f0] sm:$0xff] }
  0x3a   :  { %327 = vmatprep.subr.mxu0 %v228_v24  ;;  %398 = vmatprep.subr.mxu1 %v230_v25  ;;  %v144_v6 = vld [vmem:[#allocation2 + $0x3a8] sm:$0xff]  ;;  %v146_v7 = vld [vmem:[#allocation2 + $0x3b8] sm:$0xff]  ;;  %v143_v8 = vld [vmem:[#allocation2 + $0x3a0] sm:$0xff] }
  0x3b   :  { %328 = vmatpush2.msra.mxu0 %v227_v26  ;;  %399 = vmatpush2.msra.mxu1 %v229_v27  ;;  %v145_v9 = vld [vmem:[#allocation2 + $0x3b0] sm:$0xff]  ;;  %v136_v10 = vld [vmem:[#allocation2 + $0x368] sm:$0xff]  ;;  %v138_v11 = vld [vmem:[#allocation2 + $0x378] sm:$0xff] }
  0x3c   :  { %329 = vmatprep.subr.mxu0 %v220_v28  ;;  %400 = vmatprep.subr.mxu1 %v222_v29  ;;  %v135_v12 = vld [vmem:[#allocation2 + $0x360] sm:$0xff]  ;;  %v137_v13 = vld [vmem:[#allocation2 + $0x370] sm:$0xff]  ;;  %v128_v14 = vld [vmem:[#allocation2 + $0x328] sm:$0xff] }
  0x3d   :  { %330 = vmatpush2.msra.mxu0 %v219_v30  ;;  %401 = vmatpush2.msra.mxu1 %v221_v31  ;;  %v130_v15 = vld [vmem:[#allocation2 + $0x338] sm:$0xff]  ;;  %v127_v16 = vld [vmem:[#allocation2 + $0x320] sm:$0xff]  ;;  %v129_v17 = vld [vmem:[#allocation2 + $0x330] sm:$0xff] }
  0x3e   :  { %331 = vmatprep.subr.mxu0 %v212_v32  ;;  %402 = vmatprep.subr.mxu1 %v214_v33  ;;  %v120_v18 = vld [vmem:[#allocation2 + $0x2e8] sm:$0xff]  ;;  %v122_v19 = vld [vmem:[#allocation2 + $0x2f8] sm:$0xff]  ;;  %v119_v20 = vld [vmem:[#allocation2 + $0x2e0] sm:$0xff] }
  0x3f   :  { %332 = vmatpush2.msra.mxu0 %v211_v34  ;;  %403 = vmatpush2.msra.mxu1 %v213_v35  ;;  %v121_v21 = vld [vmem:[#allocation2 + $0x2f0] sm:$0xff]  ;;  %v112_v22 = vld [vmem:[#allocation2 + $0x2a8] sm:$0xff]  ;;  %v114_v23 = vld [vmem:[#allocation2 + $0x2b8] sm:$0xff] }
  0x40   :  { %333 = vmatprep.subr.mxu0 %v204_v36  ;;  %404 = vmatprep.subr.mxu1 %v206_v37  ;;  %v111_v24 = vld [vmem:[#allocation2 + $0x2a0] sm:$0xff]  ;;  %v113_v25 = vld [vmem:[#allocation2 + $0x2b0] sm:$0xff]  ;;  %v104_v26 = vld [vmem:[#allocation2 + $0x268] sm:$0xff] }
  0x41   :  { %334 = vmatpush2.msra.mxu0 %v203_v38  ;;  %405 = vmatpush2.msra.mxu1 %v205_v39  ;;  %v106_v27 = vld [vmem:[#allocation2 + $0x278] sm:$0xff]  ;;  %v103_v28 = vld [vmem:[#allocation2 + $0x260] sm:$0xff]  ;;  %v105_v29 = vld [vmem:[#allocation2 + $0x270] sm:$0xff] }
  0x42   :  { %335 = vmatprep.subr.mxu0 %v196_v40  ;;  %406 = vmatprep.subr.mxu1 %v198_v41  ;;  %v96_v30 = vld [vmem:[#allocation2 + $0x228] sm:$0xff]  ;;  %v98_v31 = vld [vmem:[#allocation2 + $0x238] sm:$0xff]  ;;  %v95_v32 = vld [vmem:[#allocation2 + $0x220] sm:$0xff] }
  0x43   :  { %336 = vmatpush2.msra.mxu0 %v195_v42  ;;  %407 = vmatpush2.msra.mxu1 %v197_v43  ;;  %v97_v33 = vld [vmem:[#allocation2 + $0x230] sm:$0xff]  ;;  %v88_v34 = vld [vmem:[#allocation2 + $0x1e8] sm:$0xff]  ;;  %v90_v35 = vld [vmem:[#allocation2 + $0x1f8] sm:$0xff] }
  0x44   :  { %337 = vmatprep.subr.mxu0 %v188_v44  ;;  %408 = vmatprep.subr.mxu1 %v190_v45  ;;  %v87_v36 = vld [vmem:[#allocation2 + $0x1e0] sm:$0xff]  ;;  %v89_v37 = vld [vmem:[#allocation2 + $0x1f0] sm:$0xff]  ;;  %v80_v38 = vld [vmem:[#allocation2 + $0x1a8] sm:$0xff] }
  0x45   :  { %338 = vmatpush2.msra.mxu0 %v187_v46  ;;  %409 = vmatpush2.msra.mxu1 %v189_v47  ;;  %v82_v39 = vld [vmem:[#allocation2 + $0x1b8] sm:$0xff]  ;;  %v79_v40 = vld [vmem:[#allocation2 + $0x1a0] sm:$0xff]  ;;  %v81_v41 = vld [vmem:[#allocation2 + $0x1b0] sm:$0xff] }
  0x46   :  { %339 = vmatprep.subr.mxu0 %v180_v48  ;;  %410 = vmatprep.subr.mxu1 %v182_v49  ;;  %v72_v42 = vld [vmem:[#allocation2 + $0x168] sm:$0xff]  ;;  %v74_v43 = vld [vmem:[#allocation2 + $0x178] sm:$0xff]  ;;  %v71_v44 = vld [vmem:[#allocation2 + $0x160] sm:$0xff] }
  0x47   :  { %340 = vmatpush2.msra.mxu0 %v179_v50  ;;  %411 = vmatpush2.msra.mxu1 %v181_v51  ;;  %v73_v45 = vld [vmem:[#allocation2 + $0x170] sm:$0xff]  ;;  %v64_v46 = vld [vmem:[#allocation2 + $0x128] sm:$0xff]  ;;  %v66_v47 = vld [vmem:[#allocation2 + $0x138] sm:$0xff] }
  0x48   :  { %341 = vmatprep.subr.mxu0 %v172_v52  ;;  %412 = vmatprep.subr.mxu1 %v174_v53  ;;  %v63_v48 = vld [vmem:[#allocation2 + $0x120] sm:$0xff]  ;;  %v65_v49 = vld [vmem:[#allocation2 + $0x130] sm:$0xff]  ;;  %v56_v50 = vld [vmem:[#allocation2 + $0xe8] sm:$0xff] }
  0x49   :  { %342 = vmatpush2.msra.mxu0 %v171_v54  ;;  %413 = vmatpush2.msra.mxu1 %v173_v55  ;;  %v58_v51 = vld [vmem:[#allocation2 + $0xf8] sm:$0xff]  ;;  %v55_v52 = vld [vmem:[#allocation2 + $0xe0] sm:$0xff]  ;;  %v57_v53 = vld [vmem:[#allocation2 + $0xf0] sm:$0xff] }
  0x4a   :  { %343 = vmatprep.subr.mxu0 %v164_v56  ;;  %414 = vmatprep.subr.mxu1 %v166_v57  ;;  %v48_v54 = vld [vmem:[#allocation2 + $0xa8] sm:$0xff]  ;;  %v50_v55 = vld [vmem:[#allocation2 + $0xb8] sm:$0xff]  ;;  %v47_v56 = vld [vmem:[#allocation2 + $0xa0] sm:$0xff] }
  0x4b   :  { %344 = vmatpush2.msra.mxu0 %v163_v58  ;;  %415 = vmatpush2.msra.mxu1 %v165_v59  ;;  %v49_v57 = vld [vmem:[#allocation2 + $0xb0] sm:$0xff]  ;;  %v40_v58 = vld [vmem:[#allocation2 + $0x68] sm:$0xff]  ;;  %v42_v59 = vld [vmem:[#allocation2 + $0x78] sm:$0xff] }
  0x4c   :  { %345 = vmatprep.subr.mxu0 %v156_v60  ;;  %416 = vmatprep.subr.mxu1 %v158_v61  ;;  %v39_v60 = vld [vmem:[#allocation2 + $0x60] sm:$0xff]  ;;  %v41_v61 = vld [vmem:[#allocation2 + $0x70] sm:$0xff] }
  0x4d   :  { %346 = vmatpush2.msra.mxu0 %v155_v62  ;;  %347 = vmatprep.mubr.f32.mxu0 %v629_v63  ;;  %v32_v62 = vld [vmem:[#allocation2 + $0x28] sm:$0xff] }
  0x4e   :  { %417 = vmatpush2.msra.mxu1 %v157_v0  ;;  %418 = vmatprep.mubr.f32.mxu1 %v629_v63  ;;  %v34_v0 = vld [vmem:[#allocation2 + $0x38] sm:$0xff] }
  0x4f   :  { %348 = vmatmul.mubr.f32.vlgmr.msra.gmra.mxu0 %v634_v1  ;;  %419 = vmatmul.mubr.f32.vlgmr.msra.gmra.mxu1 %v634_v1 }
  0x50   :  { %425 = vmatprep.subr.mxu0 %v152_v2  ;;  %496 = vmatprep.subr.mxu1 %v154_v3  ;;  %v31_v2 = vld [vmem:[#allocation2 + $0x20] sm:$0xff]  ;;  %v33_v3 = vld [vmem:[#allocation2 + $0x30] sm:$0xff] }
  0x51   :  { %426 = vmatpush1.msra.mxu0 %v151_v4  ;;  %497 = vmatpush1.msra.mxu1 %v153_v5  ;;  %v280_v4 = vld [vmem:[#allocation2 + $0x7e8] sm:$0xff]  ;;  %v282_v5 = vld [vmem:[#allocation2 + $0x7f8] sm:$0xff] }
  0x52   :  { %427 = vmatprep.subr.mxu0 %v144_v6  ;;  %498 = vmatprep.subr.mxu1 %v146_v7  ;;  %v279_v6 = vld [vmem:[#allocation2 + $0x7e0] sm:$0xff]  ;;  %v281_v7 = vld [vmem:[#allocation2 + $0x7f0] sm:$0xff] }
  0x53   :  { %428 = vmatpush1.msra.mxu0 %v143_v8  ;;  %499 = vmatpush1.msra.mxu1 %v145_v9  ;;  %v272_v8 = vld [vmem:[#allocation2 + $0x7a8] sm:$0xff]  ;;  %v274_v9 = vld [vmem:[#allocation2 + $0x7b8] sm:$0xff] }
  0x54   :  { %429 = vmatprep.subr.mxu0 %v136_v10  ;;  %500 = vmatprep.subr.mxu1 %v138_v11  ;;  %v271_v10 = vld [vmem:[#allocation2 + $0x7a0] sm:$0xff]  ;;  %v273_v11 = vld [vmem:[#allocation2 + $0x7b0] sm:$0xff] }
  0x55   :  { %430 = vmatpush1.msra.mxu0 %v135_v12  ;;  %501 = vmatpush1.msra.mxu1 %v137_v13  ;;  %v264_v12 = vld [vmem:[#allocation2 + $0x768] sm:$0xff]  ;;  %v266_v13 = vld [vmem:[#allocation2 + $0x778] sm:$0xff] }
  0x56   :  { %431 = vmatprep.subr.mxu0 %v128_v14  ;;  %502 = vmatprep.subr.mxu1 %v130_v15  ;;  %v263_v14 = vld [vmem:[#allocation2 + $0x760] sm:$0xff]  ;;  %v265_v15 = vld [vmem:[#allocation2 + $0x770] sm:$0xff] }
  0x57   :  { %432 = vmatpush1.msra.mxu0 %v127_v16  ;;  %503 = vmatpush1.msra.mxu1 %v129_v17  ;;  %v256_v16 = vld [vmem:[#allocation2 + $0x728] sm:$0xff]  ;;  %v258_v17 = vld [vmem:[#allocation2 + $0x738] sm:$0xff] }
  0x58   :  { %433 = vmatprep.subr.mxu0 %v120_v18  ;;  %504 = vmatprep.subr.mxu1 %v122_v19  ;;  %v255_v18 = vld [vmem:[#allocation2 + $0x720] sm:$0xff]  ;;  %v257_v19 = vld [vmem:[#allocation2 + $0x730] sm:$0xff] }
  0x59   :  { %434 = vmatpush1.msra.mxu0 %v119_v20  ;;  %505 = vmatpush1.msra.mxu1 %v121_v21  ;;  %v248_v20 = vld [vmem:[#allocation2 + $0x6e8] sm:$0xff]  ;;  %v250_v21 = vld [vmem:[#allocation2 + $0x6f8] sm:$0xff] }
  0x5a   :  { %435 = vmatprep.subr.mxu0 %v112_v22  ;;  %506 = vmatprep.subr.mxu1 %v114_v23  ;;  %v247_v22 = vld [vmem:[#allocation2 + $0x6e0] sm:$0xff]  ;;  %v249_v23 = vld [vmem:[#allocation2 + $0x6f0] sm:$0xff] }
  0x5b   :  { %436 = vmatpush1.msra.mxu0 %v111_v24  ;;  %507 = vmatpush1.msra.mxu1 %v113_v25  ;;  %v240_v24 = vld [vmem:[#allocation2 + $0x6a8] sm:$0xff]  ;;  %v242_v25 = vld [vmem:[#allocation2 + $0x6b8] sm:$0xff] }
  0x5c   :  { %437 = vmatprep.subr.mxu0 %v104_v26  ;;  %508 = vmatprep.subr.mxu1 %v106_v27  ;;  %v239_v26 = vld [vmem:[#allocation2 + $0x6a0] sm:$0xff]  ;;  %v241_v27 = vld [vmem:[#allocation2 + $0x6b0] sm:$0xff] }
  0x5d   :  { %438 = vmatpush1.msra.mxu0 %v103_v28  ;;  %509 = vmatpush1.msra.mxu1 %v105_v29  ;;  %v232_v28 = vld [vmem:[#allocation2 + $0x668] sm:$0xff]  ;;  %v234_v29 = vld [vmem:[#allocation2 + $0x678] sm:$0xff] }
  0x5e   :  { %439 = vmatprep.subr.mxu0 %v96_v30  ;;  %510 = vmatprep.subr.mxu1 %v98_v31  ;;  %v231_v30 = vld [vmem:[#allocation2 + $0x660] sm:$0xff]  ;;  %v233_v31 = vld [vmem:[#allocation2 + $0x670] sm:$0xff] }
  0x5f   :  { %440 = vmatpush1.msra.mxu0 %v95_v32  ;;  %511 = vmatpush1.msra.mxu1 %v97_v33  ;;  %v224_v32 = vld [vmem:[#allocation2 + $0x628] sm:$0xff]  ;;  %v226_v33 = vld [vmem:[#allocation2 + $0x638] sm:$0xff] }
  0x60   :  { %441 = vmatprep.subr.mxu0 %v88_v34  ;;  %512 = vmatprep.subr.mxu1 %v90_v35  ;;  %v223_v34 = vld [vmem:[#allocation2 + $0x620] sm:$0xff]  ;;  %v225_v35 = vld [vmem:[#allocation2 + $0x630] sm:$0xff] }
  0x61   :  { %442 = vmatpush1.msra.mxu0 %v87_v36  ;;  %513 = vmatpush1.msra.mxu1 %v89_v37  ;;  %v216_v36 = vld [vmem:[#allocation2 + $0x5e8] sm:$0xff]  ;;  %v218_v37 = vld [vmem:[#allocation2 + $0x5f8] sm:$0xff] }
  0x62   :  { %443 = vmatprep.subr.mxu0 %v80_v38  ;;  %514 = vmatprep.subr.mxu1 %v82_v39  ;;  %v215_v38 = vld [vmem:[#allocation2 + $0x5e0] sm:$0xff]  ;;  %v217_v39 = vld [vmem:[#allocation2 + $0x5f0] sm:$0xff] }
  0x63   :  { %444 = vmatpush1.msra.mxu0 %v79_v40  ;;  %515 = vmatpush1.msra.mxu1 %v81_v41  ;;  %v208_v40 = vld [vmem:[#allocation2 + $0x5a8] sm:$0xff]  ;;  %v210_v41 = vld [vmem:[#allocation2 + $0x5b8] sm:$0xff] }
  0x64   :  { %445 = vmatprep.subr.mxu0 %v72_v42  ;;  %516 = vmatprep.subr.mxu1 %v74_v43  ;;  %v207_v42 = vld [vmem:[#allocation2 + $0x5a0] sm:$0xff]  ;;  %v209_v43 = vld [vmem:[#allocation2 + $0x5b0] sm:$0xff] }
  0x65   :  { %446 = vmatpush1.msra.mxu0 %v71_v44  ;;  %517 = vmatpush1.msra.mxu1 %v73_v45  ;;  %v200_v44 = vld [vmem:[#allocation2 + $0x568] sm:$0xff]  ;;  %v202_v45 = vld [vmem:[#allocation2 + $0x578] sm:$0xff] }
  0x66   :  { %447 = vmatprep.subr.mxu0 %v64_v46  ;;  %518 = vmatprep.subr.mxu1 %v66_v47  ;;  %v199_v46 = vld [vmem:[#allocation2 + $0x560] sm:$0xff]  ;;  %v201_v47 = vld [vmem:[#allocation2 + $0x570] sm:$0xff] }
  0x67   :  { %448 = vmatpush1.msra.mxu0 %v63_v48  ;;  %519 = vmatpush1.msra.mxu1 %v65_v49  ;;  %v192_v48 = vld [vmem:[#allocation2 + $0x528] sm:$0xff]  ;;  %v194_v49 = vld [vmem:[#allocation2 + $0x538] sm:$0xff] }
  0x68   :  { %449 = vmatprep.subr.mxu0 %v56_v50  ;;  %520 = vmatprep.subr.mxu1 %v58_v51  ;;  %v191_v50 = vld [vmem:[#allocation2 + $0x520] sm:$0xff]  ;;  %v193_v51 = vld [vmem:[#allocation2 + $0x530] sm:$0xff] }
  0x69   :  { %450 = vmatpush1.msra.mxu0 %v55_v52  ;;  %521 = vmatpush1.msra.mxu1 %v57_v53  ;;  %v184_v52 = vld [vmem:[#allocation2 + $0x4e8] sm:$0xff]  ;;  %v186_v53 = vld [vmem:[#allocation2 + $0x4f8] sm:$0xff] }
  0x6a   :  { %451 = vmatprep.subr.mxu0 %v48_v54  ;;  %522 = vmatprep.subr.mxu1 %v50_v55  ;;  %v183_v54 = vld [vmem:[#allocation2 + $0x4e0] sm:$0xff]  ;;  %v185_v55 = vld [vmem:[#allocation2 + $0x4f0] sm:$0xff] }
  0x6b   :  { %452 = vmatpush1.msra.mxu0 %v47_v56  ;;  %523 = vmatpush1.msra.mxu1 %v49_v57  ;;  %v176_v56 = vld [vmem:[#allocation2 + $0x4a8] sm:$0xff]  ;;  %v178_v57 = vld [vmem:[#allocation2 + $0x4b8] sm:$0xff] }
  0x6c   :  { %453 = vmatprep.subr.mxu0 %v40_v58  ;;  %524 = vmatprep.subr.mxu1 %v42_v59  ;;  %v175_v58 = vld [vmem:[#allocation2 + $0x4a0] sm:$0xff]  ;;  %v177_v59 = vld [vmem:[#allocation2 + $0x4b0] sm:$0xff] }
  0x6d   :  { %454 = vmatpush1.msra.mxu0 %v39_v60  ;;  %525 = vmatpush1.msra.mxu1 %v41_v61  ;;  %v168_v60 = vld [vmem:[#allocation2 + $0x468] sm:$0xff]  ;;  %v170_v61 = vld [vmem:[#allocation2 + $0x478] sm:$0xff] }
  0x6e   :  { %455 = vmatprep.subr.mxu0 %v32_v62  ;;  %526 = vmatprep.subr.mxu1 %v34_v0  ;;  %v167_v62 = vld [vmem:[#allocation2 + $0x460] sm:$0xff]  ;;  %v169_v0 = vld [vmem:[#allocation2 + $0x470] sm:$0xff] }
  0x6f   :  { %456 = vmatpush1.msra.mxu0 %v31_v2  ;;  %527 = vmatpush1.msra.mxu1 %v33_v3  ;;  %v160_v2 = vld [vmem:[#allocation2 + $0x428] sm:$0xff]  ;;  %v162_v3 = vld [vmem:[#allocation2 + $0x438] sm:$0xff] }
  0x70   :  { %457 = vmatprep.subr.mxu0 %v280_v4  ;;  %528 = vmatprep.subr.mxu1 %v282_v5  ;;  %v159_v4 = vld [vmem:[#allocation2 + $0x420] sm:$0xff]  ;;  %v161_v5 = vld [vmem:[#allocation2 + $0x430] sm:$0xff] }
  0x71   :  { %458 = vmatpush2.msra.mxu0 %v279_v6  ;;  %529 = vmatpush2.msra.mxu1 %v281_v7 }
  0x72   :  { %459 = vmatprep.subr.mxu0 %v272_v8  ;;  %530 = vmatprep.subr.mxu1 %v274_v9 }
  0x73   :  { %460 = vmatpush2.msra.mxu0 %v271_v10  ;;  %531 = vmatpush2.msra.mxu1 %v273_v11 }
  0x74   :  { %461 = vmatprep.subr.mxu0 %v264_v12  ;;  %532 = vmatprep.subr.mxu1 %v266_v13 }
  0x75   :  { %462 = vmatpush2.msra.mxu0 %v263_v14  ;;  %533 = vmatpush2.msra.mxu1 %v265_v15 }
  0x76   :  { %463 = vmatprep.subr.mxu0 %v256_v16  ;;  %534 = vmatprep.subr.mxu1 %v258_v17 }
  0x77   :  { %464 = vmatpush2.msra.mxu0 %v255_v18  ;;  %535 = vmatpush2.msra.mxu1 %v257_v19 }
  0x78   :  { %465 = vmatprep.subr.mxu0 %v248_v20  ;;  %536 = vmatprep.subr.mxu1 %v250_v21 }
  0x79   :  { %466 = vmatpush2.msra.mxu0 %v247_v22  ;;  %537 = vmatpush2.msra.mxu1 %v249_v23 }
  0x7a   :  { %467 = vmatprep.subr.mxu0 %v240_v24  ;;  %538 = vmatprep.subr.mxu1 %v242_v25 }
  0x7b   :  { %468 = vmatpush2.msra.mxu0 %v239_v26  ;;  %539 = vmatpush2.msra.mxu1 %v241_v27 }
  0x7c   :  { %469 = vmatprep.subr.mxu0 %v232_v28  ;;  %540 = vmatprep.subr.mxu1 %v234_v29 }
  0x7d   :  { %470 = vmatpush2.msra.mxu0 %v231_v30  ;;  %541 = vmatpush2.msra.mxu1 %v233_v31 }
  0x7e   :  { %471 = vmatprep.subr.mxu0 %v224_v32  ;;  %542 = vmatprep.subr.mxu1 %v226_v33 }
  0x7f   :  { %472 = vmatpush2.msra.mxu0 %v223_v34  ;;  %543 = vmatpush2.msra.mxu1 %v225_v35 }
  0x80   :  { %473 = vmatprep.subr.mxu0 %v216_v36  ;;  %544 = vmatprep.subr.mxu1 %v218_v37 }
  0x81   :  { %474 = vmatpush2.msra.mxu0 %v215_v38  ;;  %545 = vmatpush2.msra.mxu1 %v217_v39 }
  0x82   :  { %475 = vmatprep.subr.mxu0 %v208_v40  ;;  %546 = vmatprep.subr.mxu1 %v210_v41 }
  0x83   :  { %476 = vmatpush2.msra.mxu0 %v207_v42  ;;  %547 = vmatpush2.msra.mxu1 %v209_v43 }
  0x84   :  { %477 = vmatprep.subr.mxu0 %v200_v44  ;;  %548 = vmatprep.subr.mxu1 %v202_v45 }
  0x85   :  { %478 = vmatpush2.msra.mxu0 %v199_v46  ;;  %549 = vmatpush2.msra.mxu1 %v201_v47 }
  0x86   :  { %479 = vmatprep.subr.mxu0 %v192_v48  ;;  %550 = vmatprep.subr.mxu1 %v194_v49 }
  0x87   :  { %480 = vmatpush2.msra.mxu0 %v191_v50  ;;  %551 = vmatpush2.msra.mxu1 %v193_v51 }
  0x88   :  { %481 = vmatprep.subr.mxu0 %v184_v52  ;;  %552 = vmatprep.subr.mxu1 %v186_v53 }
  0x89   :  { %482 = vmatpush2.msra.mxu0 %v183_v54  ;;  %553 = vmatpush2.msra.mxu1 %v185_v55 }
  0x8a   :  { %483 = vmatprep.subr.mxu0 %v176_v56  ;;  %554 = vmatprep.subr.mxu1 %v178_v57 }
  0x8b   :  { %484 = vmatpush2.msra.mxu0 %v175_v58  ;;  %555 = vmatpush2.msra.mxu1 %v177_v59 }
  0x8c   :  { %485 = vmatprep.subr.mxu0 %v168_v60  ;;  %556 = vmatprep.subr.mxu1 %v170_v61 }
  0x8d   :  { %486 = vmatpush2.msra.mxu0 %v167_v62  ;;  %557 = vmatpush2.msra.mxu1 %v169_v0 }
  0x8e   :  { %487 = vmatprep.subr.mxu0 %v160_v2  ;;  %558 = vmatprep.subr.mxu1 %v162_v3 }
  0x8f   :  { %488 = vmatpush2.msra.mxu0 %v159_v4  ;;  %489 = vmatprep.mubr.f32.mxu0 %v629_v63 }
  0x90   :  { %559 = vmatpush2.msra.mxu1 %v161_v5  ;;  %560 = vmatprep.mubr.f32.mxu1 %v629_v63 }
  0x91   :  { %490 = vmatmul.mubr.f32.vlgmr.msra.gmra.mxu0 %v634_v1  ;;  %561 = vmatmul.mubr.f32.vlgmr.msra.gmra.mxu1 %v634_v1 }
 0x10f   :  { %v349_v6 = vpop.f32.mrf.mxu0  ;;  %v420_v7 = vpop.f32.mrf.mxu1 }
 0x110   :  { %567 = vst [vmem:[%s670_s2] sm:$0xff] %v349_v6  ;;  %569 = vst [vmem:[%s670_s2 + $0x10] sm:$0xff] %v420_v7 }
 0x111   :  { %v351_v8 = vpop.f32.mrf.mxu0  ;;  %v422_v9 = vpop.f32.mrf.mxu1 }
 0x112   :  { %568 = vst [vmem:[%s670_s2 + $0x8] sm:$0xff] %v351_v8  ;;  %570 = vst [vmem:[%s670_s2 + $0x18] sm:$0xff] %v422_v9 }
 0x151   :  { %v491_v63 = vpop.f32.mrf.mxu0  ;;  %v562_v1 = vpop.f32.mrf.mxu1 }
 0x152   :  { %571 = vst [vmem:[%s670_s2 + $0x20] sm:$0xff] %v491_v63  ;;  %573 = vst [vmem:[%s670_s2 + $0x30] sm:$0xff] %v562_v1 }
 0x153   :  { %v493_v10 = vpop.f32.mrf.mxu0  ;;  %v564_v11 = vpop.f32.mrf.mxu1 }
 0x154   :  { %572 = vst [vmem:[%s670_s2 + $0x28] sm:$0xff] %v493_v10  ;;  %574 = vst [vmem:[%s670_s2 + $0x38] sm:$0xff] %v564_v11 }
 0x155   :  { %579 = vsyncpa [#allocation3], 1 }

</bundles_post_ra>
